<compile_context>
chip_gen: v5e
topology: v5e:2x2
jax: 0.10.0
libtpu: 0.0.40
codegen_flags: <defaults>
</compile_context>

<pallas_src>
import jax
import jax.numpy as jnp
from jax.experimental import pallas as pl
from jax.experimental.pallas import tpu as pltpu

LANE = 128  # TPU lane width — keep the output store lane-dense


def _round_up(x, m):
    return ((x + m - 1) // m) * m


def dqn_kernel(x_ref, w1_ref, b1_ref, w2_ref, b2_ref, w3_ref, out_ref):
    """Fused 3-layer MLP tile:
         relu(x @ W1 + b1) -> relu(. @ W2 + b2) -> . @ W3   (fc3 has no bias)

    Matmuls run on the MXU in bf16 with f32 accumulation; bias-add / ReLU stay
    on the f32 accumulator, then downcast to bf16 feeding the next matmul.
    """
    x = x_ref[...]                                                  # (TB, D) bf16

    h1 = jnp.dot(x, w1_ref[...], preferred_element_type=jnp.float32)
    h1 = jnp.maximum(h1 + b1_ref[...], 0.0).astype(jnp.bfloat16)

    h2 = jnp.dot(h1, w2_ref[...], preferred_element_type=jnp.float32)
    h2 = jnp.maximum(h2 + b2_ref[...], 0.0).astype(jnp.bfloat16)

    out_ref[...] = jnp.dot(h2, w3_ref[...], preferred_element_type=jnp.float32)


@jax.jit
def dqn_forward(state, w1, b1, w2, b2, w3):
    """Pallas wrapper.

    state: (B, input_dims) f32.  Weights stored (in, out) vs. torch's (out, in)
    so the kernel does plain x @ W on the MXU.  Biases are (1, out) f32 rows.
    """
    batch, in_dims = state.shape
    hidden = w1.shape[1]
    n_actions = w3.shape[1]

    # ---- layout prep (cheap, fused by XLA) ---------------------------------
    x_bf = state.astype(jnp.bfloat16)
    w1_bf = w1.astype(jnp.bfloat16)
    w2_bf = w2.astype(jnp.bfloat16)
    # Lane-dense output: pad fc3's columns up to a multiple of 128 with zeros.
    n_pad = _round_up(n_actions, LANE)
    w3_bf = jnp.zeros((hidden, n_pad), jnp.bfloat16).at[:, :n_actions].set(
        w3.astype(jnp.bfloat16))
    b1_f = b1.reshape(1, hidden).astype(jnp.float32)
    b2_f = b2.reshape(1, hidden).astype(jnp.float32)

    # ---- batch tiling -------------------------------------------------------
    # One grid step per TB rows; pad the batch so TB divides it.  For tiny
    # batches this degenerates to a single whole-array block.
    tb = min(256, _round_up(batch, 8))
    b_pad = _round_up(batch, tb)
    if b_pad != batch:
        x_bf = jnp.pad(x_bf, ((0, b_pad - batch), (0, 0)))
    grid = (b_pad // tb,)

    cost = pl.CostEstimate(
        flops=2 * b_pad * (in_dims * hidden + hidden * hidden + hidden * n_pad),
        transcendentals=0,
        bytes_accessed=(x_bf.size * 2 + w1_bf.size * 2 + w2_bf.size * 2
                        + w3_bf.size * 2 + b1_f.size * 4 + b2_f.size * 4
                        + b_pad * n_pad * 4),
    )

    const = lambda i: (0, 0)  # weights/biases: VMEM-resident across grid steps

    out_padded = pl.pallas_call(
        dqn_kernel,
        out_shape=jax.ShapeDtypeStruct((b_pad, n_pad), jnp.float32),
        grid_spec=pltpu.PrefetchScalarGridSpec(
            num_scalar_prefetch=0,
            grid=grid,
            in_specs=[
                pl.BlockSpec((tb, in_dims), lambda i: (i, 0)),   # batch tile
                pl.BlockSpec((in_dims, hidden), const),          # W1
                pl.BlockSpec((1, hidden), const),                # b1
                pl.BlockSpec((hidden, hidden), const),           # W2
                pl.BlockSpec((1, hidden), const),                # b2
                pl.BlockSpec((hidden, n_pad), const),            # W3 (padded)
            ],
            out_specs=pl.BlockSpec((tb, n_pad), lambda i: (i, 0)),
        ),
        compiler_params=pltpu.CompilerParams(
            dimension_semantics=("parallel",),   # megacore batch sharding (v7x)
        ),
        cost_estimate=cost,
    )(x_bf, w1_bf, b1_f, w2_bf, b2_f, w3_bf)

    # Drop batch padding and the zero output columns.
    return out_padded[:batch, :n_actions]


def init_params(key, input_dims, n_actions, hidden=256):
    """Deterministic PyTorch-Linear-style init: U(-1/sqrt(fan_in), 1/sqrt(fan_in))."""
    k1, k2, k3, k4, k5 = jax.random.split(key, 5)

    def u(k, shape, fan_in):
        bound = 1.0 / jnp.sqrt(jnp.float32(fan_in))
        return jax.random.uniform(k, shape, jnp.float32, -bound, bound)

    w1 = u(k1, (input_dims, hidden), input_dims)   # stored (in, out)
    b1 = u(k2, (1, hidden), input_dims)
    w2 = u(k3, (hidden, hidden), hidden)
    b2 = u(k4, (1, hidden), hidden)
    w3 = u(k5, (hidden, n_actions), hidden)        # fc3 has no bias
    return w1, b1, w2, b2, w3


def reference_forward(state, w1, b1, w2, b2, w3):
    """Plain-JAX f32 reference for correctness checking."""
    h1 = jnp.maximum(state @ w1 + b1, 0.0)
    h2 = jnp.maximum(h1 @ w2 + b2, 0.0)
    return h2 @ w3


if __name__ == "__main__":
    input_dims = 16
    n_actions = 4
    hidden = 256

    key = jax.random.PRNGKey(0)
    k_params, k_state1, k_state2 = jax.random.split(key, 3)
    w1, b1, w2, b2, w3 = init_params(k_params, input_dims, n_actions, hidden)

    # bf16 weights/activations (f32 accumulation) -> loosen tolerance vs f32 ref.
    ATOL = 3e-2
    RTOL = 3e-2

    # Small batch (single grid step).
    batch = 8
    state = jax.random.normal(k_state1, (batch, input_dims), jnp.float32)
    actions = jax.block_until_ready(dqn_forward(state, w1, b1, w2, b2, w3))
    expected = reference_forward(state, w1, b1, w2, b2, w3)
    assert actions.shape == (batch, n_actions)
    assert jnp.allclose(actions, expected, atol=ATOL, rtol=RTOL), "mismatch (batch=8)"

    # Larger ragged batch: exercises multi-tile grid, batch padding, and the
    # parallel batch axis.
    batch2 = 260
    state2 = jax.random.normal(k_state2, (batch2, input_dims), jnp.float32)
    actions2 = jax.block_until_ready(dqn_forward(state2, w1, b1, w2, b2, w3))
    expected2 = reference_forward(state2, w1, b1, w2, b2, w3)
    assert actions2.shape == (batch2, n_actions)
    assert jnp.allclose(actions2, expected2, atol=ATOL, rtol=RTOL), "mismatch (batch=260)"

    print("KERNEL_OK")
</pallas_src>

<mosaic_0001>
module attributes {stable_mosaic.version = 11 : i64} {
  func.func @dqn_kernel(%arg0: i32, %arg1: memref<8x16xbf16, #tpu.memory_space<vmem>>, %arg2: memref<16x256xbf16, #tpu.memory_space<vmem>>, %arg3: memref<1x256xf32, #tpu.memory_space<vmem>>, %arg4: memref<256x256xbf16, #tpu.memory_space<vmem>>, %arg5: memref<1x256xf32, #tpu.memory_space<vmem>>, %arg6: memref<256x128xbf16, #tpu.memory_space<vmem>>, %arg7: memref<8x128xf32, #tpu.memory_space<vmem>>) attributes {dimension_semantics = [#tpu.dimension_semantics<parallel>], iteration_bounds = array<i64: 1>, scalar_prefetch = 0 : i64, scratch_operands = 0 : i64, tpu.core_type = #tpu.core_type<tc>, window_params = [{transform_indices = @transform_0, window_bounds = array<i64: 8, 16>}, {pipeline_mode = #tpu.pipeline_mode<synchronous>, transform_indices = @transform_1, window_bounds = array<i64: 16, 256>}, {pipeline_mode = #tpu.pipeline_mode<synchronous>, transform_indices = @transform_2, window_bounds = array<i64: 1, 256>}, {pipeline_mode = #tpu.pipeline_mode<synchronous>, transform_indices = @transform_3, window_bounds = array<i64: 256, 256>}, {pipeline_mode = #tpu.pipeline_mode<synchronous>, transform_indices = @transform_4, window_bounds = array<i64: 1, 256>}, {pipeline_mode = #tpu.pipeline_mode<synchronous>, transform_indices = @transform_5, window_bounds = array<i64: 256, 128>}, {transform_indices = @transform_6, window_bounds = array<i64: 8, 128>}]} {
    %c0 = arith.constant 0 : index
    %c0_0 = arith.constant 0 : index
    %0 = vector.load %arg1[%c0, %c0_0] : memref<8x16xbf16, #tpu.memory_space<vmem>>, vector<8x16xbf16>
    %c0_1 = arith.constant 0 : index
    %c0_2 = arith.constant 0 : index
    %1 = vector.load %arg2[%c0_1, %c0_2] : memref<16x256xbf16, #tpu.memory_space<vmem>>, vector<16x256xbf16>
    %cst = arith.constant dense<0.000000e+00> : vector<8x256xf32>
    %2 = tpu.matmul %0, %1, %cst {dimension_numbers = #tpu.dot_dimension_numbers<[1], [0], [0], [1], [0, 0, 1, 1], [], []>} : vector<8x16xbf16>, vector<16x256xbf16>, vector<8x256xf32> -> vector<8x256xf32>
    %c0_3 = arith.constant 0 : index
    %c0_4 = arith.constant 0 : index
    %3 = vector.load %arg3[%c0_3, %c0_4] : memref<1x256xf32, #tpu.memory_space<vmem>>, vector<1x256xf32>
    %4 = vector.broadcast %3 : vector<1x256xf32> to vector<8x256xf32>
    %5 = arith.addf %2, %4 : vector<8x256xf32>
    %cst_5 = arith.constant 0.000000e+00 : f32
    %6 = vector.broadcast %cst_5 : f32 to vector<8x256xf32>
    %7 = arith.maximumf %5, %6 : vector<8x256xf32>
    %8 = arith.truncf %7 : vector<8x256xf32> to vector<8x256xbf16>
    %c0_6 = arith.constant 0 : index
    %c0_7 = arith.constant 0 : index
    %9 = vector.load %arg4[%c0_6, %c0_7] : memref<256x256xbf16, #tpu.memory_space<vmem>>, vector<256x256xbf16>
    %cst_8 = arith.constant dense<0.000000e+00> : vector<8x256xf32>
    %10 = tpu.matmul %8, %9, %cst_8 {dimension_numbers = #tpu.dot_dimension_numbers<[1], [0], [0], [1], [0, 0, 1, 1], [], []>} : vector<8x256xbf16>, vector<256x256xbf16>, vector<8x256xf32> -> vector<8x256xf32>
    %c0_9 = arith.constant 0 : index
    %c0_10 = arith.constant 0 : index
    %11 = vector.load %arg5[%c0_9, %c0_10] : memref<1x256xf32, #tpu.memory_space<vmem>>, vector<1x256xf32>
    %12 = vector.broadcast %11 : vector<1x256xf32> to vector<8x256xf32>
    %13 = arith.addf %10, %12 : vector<8x256xf32>
    %cst_11 = arith.constant 0.000000e+00 : f32
    %14 = vector.broadcast %cst_11 : f32 to vector<8x256xf32>
    %15 = arith.maximumf %13, %14 : vector<8x256xf32>
    %16 = arith.truncf %15 : vector<8x256xf32> to vector<8x256xbf16>
    %c0_12 = arith.constant 0 : index
    %c0_13 = arith.constant 0 : index
    %17 = vector.load %arg6[%c0_12, %c0_13] : memref<256x128xbf16, #tpu.memory_space<vmem>>, vector<256x128xbf16>
    %cst_14 = arith.constant dense<0.000000e+00> : vector<8x128xf32>
    %18 = tpu.matmul %16, %17, %cst_14 {dimension_numbers = #tpu.dot_dimension_numbers<[1], [0], [0], [1], [0, 0, 1, 1], [], []>} : vector<8x256xbf16>, vector<256x128xbf16>, vector<8x128xf32> -> vector<8x128xf32>
    %c0_15 = arith.constant 0 : index
    %c0_16 = arith.constant 0 : index
    %19 = vector.load %arg7[%c0_15, %c0_16] : memref<8x128xf32, #tpu.memory_space<vmem>>, vector<8x128xf32>
    tpu.vector_store %arg7[%c0_15, %c0_16], %18 {strides = array<i32>} : memref<8x128xf32, #tpu.memory_space<vmem>>, vector<8x128xf32>,
    return
  }
  func.func @transform_0(%arg0: i32) -> (i32, i32) {
    %c0_i32 = arith.constant 0 : i32
    %c0_i32_0 = arith.constant 0 : i32
    return %arg0, %c0_i32 : i32, i32
  }
  func.func @transform_1(%arg0: i32) -> (i32, i32) {
    %c0_i32 = arith.constant 0 : i32
    %c0_i32_0 = arith.constant 0 : i32
    %c0_i32_1 = arith.constant 0 : i32
    return %c0_i32, %c0_i32_0 : i32, i32
  }
  func.func @transform_2(%arg0: i32) -> (i32, i32) {
    %c0_i32 = arith.constant 0 : i32
    %c0_i32_0 = arith.constant 0 : i32
    %c0_i32_1 = arith.constant 0 : i32
    return %c0_i32, %c0_i32_0 : i32, i32
  }
  func.func @transform_3(%arg0: i32) -> (i32, i32) {
    %c0_i32 = arith.constant 0 : i32
    %c0_i32_0 = arith.constant 0 : i32
    %c0_i32_1 = arith.constant 0 : i32
    return %c0_i32, %c0_i32_0 : i32, i32
  }
  func.func @transform_4(%arg0: i32) -> (i32, i32) {
    %c0_i32 = arith.constant 0 : i32
    %c0_i32_0 = arith.constant 0 : i32
    %c0_i32_1 = arith.constant 0 : i32
    return %c0_i32, %c0_i32_0 : i32, i32
  }
  func.func @transform_5(%arg0: i32) -> (i32, i32) {
    %c0_i32 = arith.constant 0 : i32
    %c0_i32_0 = arith.constant 0 : i32
    %c0_i32_1 = arith.constant 0 : i32
    return %c0_i32, %c0_i32_0 : i32, i32
  }
  func.func @transform_6(%arg0: i32) -> (i32, i32) {
    %c0_i32 = arith.constant 0 : i32
    %c0_i32_0 = arith.constant 0 : i32
    return %arg0, %c0_i32 : i32, i32
  }
}

</mosaic_0001>

<bundles_post_ra>
// kernel: dqn_forward.1
= control target key start
LH: loop header
LB: loop body
LE: loop exit
PB: predicated region body
PF: predicated region fallthrough
CT: control target
= control target key end

     0   :  { %vm43_vm0 = vcmask 130048   ;;  %s1043_s1 = inlined_call_operand.vmem [shape: bf16[16,256], index: 1, kind: input, shape index: {}]   ;;  %s1044_s0 = inlined_call_operand.vmem [shape: bf16[8,16], index: 0, kind: input, shape index: {}]   ;;  %s1045_s3 = inlined_call_operand.vmem [shape: bf16[256,256], index: 3, kind: input, shape index: {}]   ;;  %s1046_s5 = inlined_call_operand.vmem [shape: bf16[256,128], index: 5, kind: input, shape index: {}]   ;;  %s1047_s2 = inlined_call_operand.vmem [shape: f32[1,256], index: 2, kind: input, shape index: {}]   ;;  %s1048_s4 = inlined_call_operand.vmem [shape: f32[1,256], index: 4, kind: input, shape index: {}]   ;;  %s1049_s6 = inlined_call_operand.vmem [shape: f32[8,128], index: 6, kind: output, shape index: {}]  }
   0x1   :  { %v492_v0 = vld [vmem:[%s1043_s1] sm:$0xf]  ;;  %v693_v1 = vld [vmem:[%s1043_s1 + $0x4] sm:$0xf0]  ;;  %v692_v2 = vld [vmem:[%s1043_s1 + $0x4] sm:$0xf] }
   0x2   :  { %v493_v3 = vor.u32 %v693_v1, %v492_v0  ;;  %v494_v4 = vld [vmem:[%s1043_s1 + $0x8] sm:$0xf0]  ;;  %v24_v5 = vld [vmem:[%s1044_s0] sm:$0xf]  ;;  %v558_v6 = vld [vmem:[%s1045_s3 + $0x70] sm:$0xf] }
   0x3   :  { %v497_v7 = vor.u32 %v692_v2, %v494_v4  ;;  %v709_v8 = vld [vmem:[%s1045_s3 + $0x74] sm:$0xf0]  ;;  %v622_v9 = vld [vmem:[%s1045_s3 + $0xf0] sm:$0xf]  ;;  %v708_v13 = vld [vmem:[%s1045_s3 + $0x74] sm:$0xf] }
   0x4   :  { %v725_v10 = vld [vmem:[%s1045_s3 + $0xf4] sm:$0xf0]  ;;  %54 = vmatpush.bf16.msra.mxu0 %v493_v3  ;;  %v559_v11 = vor.u32 %v709_v8, %v558_v6  ;;  %v560_v14 = vld [vmem:[%s1045_s3 + $0x78] sm:$0xf0]  ;;  %v724_v15 = vld [vmem:[%s1045_s3 + $0xf4] sm:$0xf] }
   0x5   :  { %v623_v12 = vor.u32 %v725_v10, %v622_v9  ;;  %67 = vmatpush.bf16.msra.mxu1 %v497_v7  ;;  %v563_v16 = vor.u32 %v708_v13, %v560_v14  ;;  %v624_v17 = vld [vmem:[%s1045_s3 + $0xf8] sm:$0xf0]  ;;  %v550_v18 = vld [vmem:[%s1045_s3 + $0x60] sm:$0xf]  ;;  %v707_v19 = vld [vmem:[%s1045_s3 + $0x64] sm:$0xf0] }
   0x6   :  { %275 = vmatpush.bf16.msra.mxu2 %v559_v11  ;;  %v627_v20 = vor.u32 %v724_v15, %v624_v17  ;;  %v551_v21 = vor.u32 %v707_v19, %v550_v18  ;;  %v614_v22 = vld [vmem:[%s1045_s3 + $0xe0] sm:$0xf]  ;;  %v723_v23 = vld [vmem:[%s1045_s3 + $0xe4] sm:$0xf0]  ;;  %v706_v24 = vld [vmem:[%s1045_s3 + $0x64] sm:$0xf] }
   0x7   :  { %288 = vmatpush.bf16.msra.mxu3 %v623_v12  ;;  %498 = vmatmul.msk.bf16.vlgmr.msra.gmra.mxu0 %vm43_vm0, %v24_v5  ;;  %v615_v25 = vor.u32 %v723_v23, %v614_v22  ;;  %v552_v26 = vld [vmem:[%s1045_s3 + $0x68] sm:$0xf0]  ;;  %v722_v27 = vld [vmem:[%s1045_s3 + $0xe4] sm:$0xf]  ;;  %v542_v30 = vld [vmem:[%s1045_s3 + $0x50] sm:$0xf] }
   0x8   :  { %v616_v28 = vld [vmem:[%s1045_s3 + $0xe8] sm:$0xf0]  ;;  %499 = vmatmul.msk.bf16.vlgmr.msra.gmra.mxu1 %vm43_vm0, %v24_v5  ;;  %301 = vmatpush.bf16.msrb.mxu0 %v563_v16  ;;  %v555_v29 = vor.u32 %v706_v24, %v552_v26  ;;  %v705_v31 = vld [vmem:[%s1045_s3 + $0x54] sm:$0xf0]  ;;  %v606_v32 = vld [vmem:[%s1045_s3 + $0xd0] sm:$0xf] }
   0x9   :  { %314 = vmatpush.bf16.msrb.mxu1 %v627_v20  ;;  %v619_v33 = vor.u32 %v722_v27, %v616_v28  ;;  %v721_v34 = vld [vmem:[%s1045_s3 + $0xd4] sm:$0xf0]  ;;  %v704_v35 = vld [vmem:[%s1045_s3 + $0x54] sm:$0xf]  ;;  %v544_v36 = vld [vmem:[%s1045_s3 + $0x58] sm:$0xf0]  ;;  %v543_v37 = vor.u32 %v705_v31, %v542_v30 }
   0xa   :  { %276 = vmatpush.bf16.msra.mxu2 %v551_v21  ;;  %v607_v38 = vor.u32 %v721_v34, %v606_v32  ;;  %v720_v39 = vld [vmem:[%s1045_s3 + $0xd4] sm:$0xf]  ;;  %v608_v40 = vld [vmem:[%s1045_s3 + $0xd8] sm:$0xf0]  ;;  %v534_v41 = vld [vmem:[%s1045_s3 + $0x40] sm:$0xf]  ;;  %v547_v45 = vor.u32 %v704_v35, %v544_v36 }
   0xb   :  { %289 = vmatpush.bf16.msra.mxu3 %v615_v25  ;;  %v703_v42 = vld [vmem:[%s1045_s3 + $0x44] sm:$0xf0]  ;;  %v598_v43 = vld [vmem:[%s1045_s3 + $0xc0] sm:$0xf]  ;;  %v611_v46 = vor.u32 %v720_v39, %v608_v40  ;;  %v702_v47 = vld [vmem:[%s1045_s3 + $0x44] sm:$0xf] }
   0xc   :  { %v719_v44 = vld [vmem:[%s1045_s3 + $0xc4] sm:$0xf0]  ;;  %302 = vmatpush.bf16.msrb.mxu0 %v555_v29  ;;  %v536_v48 = vld [vmem:[%s1045_s3 + $0x48] sm:$0xf0]  ;;  %v535_v49 = vor.u32 %v703_v42, %v534_v41  ;;  %v718_v51 = vld [vmem:[%s1045_s3 + $0xc4] sm:$0xf] }
   0xd   :  { %315 = vmatpush.bf16.msrb.mxu1 %v619_v33  ;;  %v599_v50 = vor.u32 %v719_v44, %v598_v43  ;;  %v600_v52 = vld [vmem:[%s1045_s3 + $0xc8] sm:$0xf0]  ;;  %v526_v53 = vld [vmem:[%s1045_s3 + $0x30] sm:$0xf]  ;;  %v701_v54 = vld [vmem:[%s1045_s3 + $0x34] sm:$0xf0]  ;;  %v539_v57 = vor.u32 %v702_v47, %v536_v48 }
   0xe   :  { %277 = vmatpush.bf16.msra.mxu2 %v543_v37  ;;  %v590_v55 = vld [vmem:[%s1045_s3 + $0xb0] sm:$0xf]  ;;  %v717_v56 = vld [vmem:[%s1045_s3 + $0xb4] sm:$0xf0]  ;;  %v603_v58 = vor.u32 %v718_v51, %v600_v52  ;;  %v700_v59 = vld [vmem:[%s1045_s3 + $0x34] sm:$0xf]  ;;  %v527_v61 = vor.u32 %v701_v54, %v526_v53 }
   0xf   :  { %290 = vmatpush.bf16.msra.mxu3 %v607_v38  ;;  %v528_v60 = vld [vmem:[%s1045_s3 + $0x38] sm:$0xf0]  ;;  %v591_v62 = vor.u32 %v717_v56, %v590_v55  ;;  %v716_v63 = vld [vmem:[%s1045_s3 + $0xb4] sm:$0xf]  ;;  %v518_v1 = vld [vmem:[%s1045_s3 + $0x20] sm:$0xf] }
  0x10   :  { %303 = vmatpush.bf16.msrb.mxu0 %v547_v45  ;;  %v592_v0 = vld [vmem:[%s1045_s3 + $0xb8] sm:$0xf0]  ;;  %v699_v2 = vld [vmem:[%s1045_s3 + $0x24] sm:$0xf0]  ;;  %v582_v3 = vld [vmem:[%s1045_s3 + $0xa0] sm:$0xf]  ;;  %v531_v5 = vor.u32 %v700_v59, %v528_v60 }
  0x11   :  { %316 = vmatpush.bf16.msrb.mxu1 %v611_v46  ;;  %v715_v4 = vld [vmem:[%s1045_s3 + $0xa4] sm:$0xf0]  ;;  %v595_v6 = vor.u32 %v716_v63, %v592_v0  ;;  %v698_v7 = vld [vmem:[%s1045_s3 + $0x24] sm:$0xf]  ;;  %v520_v8 = vld [vmem:[%s1045_s3 + $0x28] sm:$0xf0]  ;;  %v519_v9 = vor.u32 %v699_v2, %v518_v1 }
  0x12   :  { %278 = vmatpush.bf16.msra.mxu2 %v535_v49  ;;  %v583_v10 = vor.u32 %v715_v4, %v582_v3  ;;  %v714_v11 = vld [vmem:[%s1045_s3 + $0xa4] sm:$0xf]  ;;  %v584_v12 = vld [vmem:[%s1045_s3 + $0xa8] sm:$0xf0]  ;;  %v523_v13 = vor.u32 %v698_v7, %v520_v8  ;;  %v510_v15 = vld [vmem:[%s1045_s3 + $0x10] sm:$0xf] }
  0x13   :  { %291 = vmatpush.bf16.msra.mxu3 %v599_v50  ;;  %v587_v14 = vor.u32 %v714_v11, %v584_v12  ;;  %v697_v16 = vld [vmem:[%s1045_s3 + $0x14] sm:$0xf0]  ;;  %v574_v17 = vld [vmem:[%s1045_s3 + $0x90] sm:$0xf]  ;;  %v696_v20 = vld [vmem:[%s1045_s3 + $0x14] sm:$0xf] }
  0x14   :  { %304 = vmatpush.bf16.msrb.mxu0 %v539_v57  ;;  %v511_v18 = vor.u32 %v697_v16, %v510_v15  ;;  %v713_v19 = vld [vmem:[%s1045_s3 + $0x94] sm:$0xf0]  ;;  %v512_v21 = vld [vmem:[%s1045_s3 + $0x18] sm:$0xf0]  ;;  %v712_v24 = vld [vmem:[%s1045_s3 + $0x94] sm:$0xf] }
  0x15   :  { %317 = vmatpush.bf16.msrb.mxu1 %v603_v58  ;;  %v575_v22 = vor.u32 %v713_v19, %v574_v17  ;;  %v515_v23 = vor.u32 %v696_v20, %v512_v21  ;;  %v576_v25 = vld [vmem:[%s1045_s3 + $0x98] sm:$0xf0]  ;;  %v502_v27 = vld [vmem:[%s1045_s3] sm:$0xf]  ;;  %v695_v28 = vld [vmem:[%s1045_s3 + $0x4] sm:$0xf0] }
  0x16   :  { %279 = vmatpush.bf16.msra.mxu2 %v527_v61  ;;  %v579_v26 = vor.u32 %v712_v24, %v576_v25  ;;  %v566_v29 = vld [vmem:[%s1045_s3 + $0x80] sm:$0xf]  ;;  %v503_v30 = vor.u32 %v695_v28, %v502_v27  ;;  %v711_v31 = vld [vmem:[%s1045_s3 + $0x84] sm:$0xf0]  ;;  %v694_v32 = vld [vmem:[%s1045_s3 + $0x4] sm:$0xf] }
  0x17   :  { %292 = vmatpush.bf16.msra.mxu3 %v591_v62  ;;  %v504_v33 = vld [vmem:[%s1045_s3 + $0x8] sm:$0xf0]  ;;  %v567_v34 = vor.u32 %v711_v31, %v566_v29  ;;  %v710_v36 = vld [vmem:[%s1045_s3 + $0x84] sm:$0xf]  ;;  %v741_v39 = vld [vmem:[%s1046_s5 + $0x78] sm:$0xff] }
  0x18   :  { %305 = vmatpush.bf16.msrb.mxu0 %v531_v5  ;;  %v507_v35 = vor.u32 %v694_v32, %v504_v33  ;;  %v568_v37 = vld [vmem:[%s1045_s3 + $0x88] sm:$0xf0]  ;;  %v733_v40 = vld [vmem:[%s1046_s5 + $0x38] sm:$0xff]  ;;  %v740_v41 = vld [vmem:[%s1046_s5 + $0x70] sm:$0xff] }
  0x19   :  { %318 = vmatpush.bf16.msrb.mxu1 %v595_v6  ;;  %v571_v38 = vor.u32 %v710_v36, %v568_v37  ;;  %v732_v42 = vld [vmem:[%s1046_s5 + $0x30] sm:$0xff]  ;;  %v739_v43 = vld [vmem:[%s1046_s5 + $0x68] sm:$0xff]  ;;  %v738_v45 = vld [vmem:[%s1046_s5 + $0x60] sm:$0xff] }
  0x1a   :  { %280 = vmatpush.bf16.msra.mxu2 %v519_v9  ;;  %v731_v44 = vld [vmem:[%s1046_s5 + $0x28] sm:$0xff]  ;;  %v730_v46 = vld [vmem:[%s1046_s5 + $0x20] sm:$0xff]  ;;  %v737_v47 = vld [vmem:[%s1046_s5 + $0x58] sm:$0xff] }
  0x1b   :  { %293 = vmatpush.bf16.msra.mxu3 %v583_v10  ;;  %v27_v48 = vld [vmem:[%s1047_s2] sm:$0x3]  ;;  %v736_v49 = vld [vmem:[%s1046_s5 + $0x50] sm:$0xff]  ;;  %v729_v62 = vld [vmem:[%s1046_s5 + $0x18] sm:$0xff] }
  0x1c   :  { %306 = vmatpush.bf16.msrb.mxu0 %v523_v13  ;;  %v29_v50 = vperm.slane %v27_v48, 0  ;;  %v30_v51 = vperm.slane %v27_v48, 1  ;;  %v735_v63 = vld [vmem:[%s1046_s5 + $0x48] sm:$0xff]  ;;  %v728_v0 = vld [vmem:[%s1046_s5 + $0x10] sm:$0xff]  ;;  %v734_v1 = vld [vmem:[%s1046_s5 + $0x40] sm:$0xff] }
  0x1d   :  { %319 = vmatpush.bf16.msrb.mxu1 %v587_v14  ;;  %v727_v2 = vld [vmem:[%s1046_s5 + $0x8] sm:$0xff]  ;;  %v726_v3 = vld [vmem:[%s1046_s5] sm:$0xff] }
  0x1e   :  { %281 = vmatpush.bf16.msra.mxu2 %v511_v18  ;;  %v109_v4 = vld [vmem:[%s1048_s4] sm:$0x3] }
  0x1f   :  { %294 = vmatpush.bf16.msra.mxu3 %v575_v22  ;;  %v112_v5 = vperm.slane %v109_v4, 1  ;;  %v111_v10 = vperm.slane %v109_v4, 0 }
  0x20   :  { %307 = vmatpush.bf16.msrb.mxu0 %v515_v23 }
  0x21   :  { %320 = vmatpush.bf16.msrb.mxu1 %v579_v26 }
  0x22   :  { %282 = vmatpush.bf16.msra.mxu2 %v503_v30 }
  0x23   :  { %295 = vmatpush.bf16.msra.mxu3 %v567_v34 }
  0x24   :  { %308 = vmatpush.bf16.msrb.mxu0 %v507_v35 }
  0x25   :  { %321 = vmatpush.bf16.msrb.mxu1 %v571_v38 }
  0x26   :  { %459 = vmatpush.bf16.msrb.mxu2 %v733_v40 }
  0x27   :  { %472 = vmatpush.bf16.msrb.mxu3 %v741_v39 }
  0x2a   :  { %460 = vmatpush.bf16.msrb.mxu2 %v732_v42 }
  0x2b   :  { %473 = vmatpush.bf16.msrb.mxu3 %v740_v41 }
  0x2e   :  { %461 = vmatpush.bf16.msrb.mxu2 %v731_v44 }
  0x2f   :  { %474 = vmatpush.bf16.msrb.mxu3 %v739_v43 }
  0x32   :  { %462 = vmatpush.bf16.msrb.mxu2 %v730_v46 }
  0x33   :  { %475 = vmatpush.bf16.msrb.mxu3 %v738_v45 }
  0x36   :  { %463 = vmatpush.bf16.msrb.mxu2 %v729_v62 }
  0x37   :  { %476 = vmatpush.bf16.msrb.mxu3 %v737_v47 }
  0x3a   :  { %464 = vmatpush.bf16.msrb.mxu2 %v728_v0 }
  0x3b   :  { %477 = vmatpush.bf16.msrb.mxu3 %v736_v49 }
  0x3e   :  { %465 = vmatpush.bf16.msrb.mxu2 %v727_v2 }
  0x3f   :  { %478 = vmatpush.bf16.msrb.mxu3 %v735_v63 }
  0x42   :  { %466 = vmatpush.bf16.msrb.mxu2 %v726_v3 }
  0x43   :  { %479 = vmatpush.bf16.msrb.mxu3 %v734_v1 }
  0x84   :  { %v56_v52 = vpop.f32.mrf.mxu0 }
  0x85   :  { %v57_v53 = vadd.f32 %v56_v52, %v29_v50  ;;  %v69_v54 = vpop.f32.mrf.mxu1 }
  0x86   :  { %v70_v55 = vadd.f32 %v69_v54, %v30_v51 }
  0x87   :  { %v73_v56 = vmax.f32 %v57_v53, 0.0 }
  0x88   :  { %v74_v57 = vmax.f32 %v70_v55, 0.0 }
  0x89   :  { %v75_v58 = vpack.c.bf16 %v73_v56, %v73_v56 }
  0x8a   :  { %v76_v59 = vpack.c.bf16 %v74_v57, %v74_v57 }
  0x8b   :  { %283 = vmatmul.bf16.vlgmr.msra.gmra.mxu2 %v75_v58  ;;  %309 = vmatmul.bf16.vlgmr.msrb.gmra.mxu0 %v75_v58 }
  0x8c   :  { %296 = vmatmul.bf16.vlgmr.msra.gmra.mxu3 %v76_v59  ;;  %322 = vmatmul.bf16.vlgmr.msrb.gmra.mxu1 %v76_v59  ;;  %v58_v60 = vpop.f32.mrf.mxu0 }
  0x8d   :  { %v71_v61 = vpop.f32.mrf.mxu1 }
 0x108   :  { %v310_v6 = vpop.f32.mrf.mxu0 }
 0x109   :  { %v311_v7 = vadd.f32 %v310_v6, %v112_v5  ;;  %v323_v8 = vpop.f32.mrf.mxu1 }
 0x10b   :  { %v324_v9 = vadd.f32 %v323_v8, %v311_v7 }
 0x10d   :  { %v328_v11 = vmax.f32 %v324_v9, 0.0 }
 0x10e   :  { %v284_v12 = vpop.f32.mrf.mxu2 }
 0x10f   :  { %v330_v13 = vpack.c.bf16 %v328_v11, %v328_v11  ;;  %v285_v14 = vadd.f32 %v284_v12, %v111_v10  ;;  %v297_v15 = vpop.f32.mrf.mxu3 }
 0x110   :  { %v312_v16 = vpop.f32.mrf.mxu0 }
 0x111   :  { %v298_v17 = vadd.f32 %v297_v15, %v285_v14  ;;  %v325_v18 = vpop.f32.mrf.mxu1  ;;  %480 = vmatmul.bf16.vlgmr.msrb.gmra.mxu3 %v330_v13 }
 0x113   :  { %v327_v19 = vmax.f32 %v298_v17, 0.0 }
 0x115   :  { %v329_v20 = vpack.c.bf16 %v327_v19, %v327_v19 }
 0x116   :  { %v286_v21 = vpop.f32.mrf.mxu2 }
 0x117   :  { %v299_v22 = vpop.f32.mrf.mxu3  ;;  %467 = vmatmul.bf16.vlgmr.msrb.gmra.mxu2 %v329_v20 }
 0x194   :  { %v481_v23 = vpop.f32.mrf.mxu3 }
 0x19a   :  { %v468_v24 = vpop.f32.mrf.mxu2 }
 0x19b   :  { %v482_v25 = vadd.f32 %v481_v23, %v468_v24 }
 0x19c   :  { %v483_v26 = vpop.f32.mrf.mxu3 }
 0x19d   :  { %485 = vst [vmem:[%s1049_s6] sm:$0xff] %v482_v25 }
 0x1a2   :  { %v470_v27 = vpop.f32.mrf.mxu2 }

</bundles_post_ra>
